<compile_context>
chip_gen: v6e
topology: v6e:2x2x1
jax: 0.10.0
libtpu: 0.0.40
codegen_flags: <defaults>
</compile_context>

<pallas_src>
import functools

import jax
import jax.numpy as jnp
from jax import lax
from jax.experimental import pallas as pl
from jax.experimental.pallas import tpu as pltpu

LOG_STD_MIN = -20.0
LOG_STD_MAX = 2.0


def _round_up(x, m):
    return (x + m - 1) // m * m


def _policy_kernel(x_ref, w1_ref, b1_ref, w2_ref, b2_ref, w3_ref, b3_ref,
                   out_ref, *, num_actions):
    # x / weights are bf16 (MXU operands); biases f32; accumulate in f32.
    h1 = jnp.dot(x_ref[...], w1_ref[...], preferred_element_type=jnp.float32)
    h1 = jnp.maximum(h1 + b1_ref[...], 0.0)          # f32 elementwise (VPU)
    h2 = jnp.dot(h1.astype(jnp.bfloat16), w2_ref[...],
                 preferred_element_type=jnp.float32)
    h2 = jnp.maximum(h2 + b2_ref[...], 0.0)
    out = jnp.dot(h2.astype(jnp.bfloat16), w3_ref[...],
                  preferred_element_type=jnp.float32) + b3_ref[...]
    # Fused log_std clamp: lanes [num_actions, P) hold log_std (+ padding);
    # clipping the padding lanes is harmless, they are sliced away outside.
    lane = lax.broadcasted_iota(jnp.int32, out.shape, 1)
    out = jnp.where(lane >= num_actions,
                    jnp.clip(out, LOG_STD_MIN, LOG_STD_MAX), out)
    # Lane-dense, full-lane store of the combined (mean | log_std | pad) slab.
    out_ref[...] = out.astype(out_ref.dtype)


def prepare_params(params):
    """One-time parameter prep (hoisted off the per-call forward path).

    Casts weights to bf16, pads w1 rows (the K dim) to a multiple of 128 and
    pads the output layer columns to a multiple of 128 lanes."""
    w1, b1, w2, b2, w3, b3 = params
    d_in, _ = w1.shape
    a2 = w3.shape[1]
    d_pad = _round_up(d_in, 128)
    p = _round_up(a2, 128)
    w1p = jnp.pad(w1.astype(jnp.bfloat16), ((0, d_pad - d_in), (0, 0)))
    w3p = jnp.pad(w3.astype(jnp.bfloat16), ((0, 0), (0, p - a2)))
    b3p = jnp.pad(b3.astype(jnp.float32), ((0, 0), (0, p - a2)))
    return (w1p, b1.astype(jnp.float32), w2.astype(jnp.bfloat16),
            b2.astype(jnp.float32), w3p, b3p)


@functools.partial(jax.jit, static_argnames=("num_actions",))
def gaussian_policy_forward(states, prepared, *, num_actions):
    """GaussianPolicy.forward: returns (mean, log_std), each [B, num_actions]."""
    w1p, b1f, w2b, b2f, w3p, b3p = prepared
    B, D_in = states.shape
    D_pad, H1 = w1p.shape
    H2 = w2b.shape[1]
    P = w3p.shape[1]
    A2 = 2 * num_actions

    # Per-call activation prep: one fused pad + bf16 cast (data-dependent, so
    # it cannot be hoisted like the weights).
    x = jnp.pad(states, ((0, 0), (0, D_pad - D_in))).astype(jnp.bfloat16)

    # Batch tiling (static at trace time):
    #   B <= 1024  -> single tile, grid=(1,): zero per-grid-step overhead.
    #   B  > 1024  -> even step count so the "parallel" axis splits evenly
    #                 across v7x's 2 TensorCores (TB <= 1024, multiple of 16).
    if B <= 1024:
        TB = _round_up(B, 16)
    else:
        n_steps = 2 * pl.cdiv(B, 2048)          # always even
        TB = _round_up(pl.cdiv(B, n_steps), 16)
    grid = (pl.cdiv(B, TB),)

    const = lambda a: pl.BlockSpec(a.shape, lambda i, _a=a: (0,) * _a.ndim)

    flops = 2 * B * (D_pad * H1 + H1 * H2 + H2 * P)
    bytes_accessed = (
        x.size * 2 + w1p.size * 2 + w2b.size * 2 + w3p.size * 2
        + b1f.size * 4 + b2f.size * 4 + b3p.size * 4 + B * P * 4)

    out = pl.pallas_call(
        functools.partial(_policy_kernel, num_actions=num_actions),
        grid=grid,
        out_shape=jax.ShapeDtypeStruct((B, P), jnp.float32),
        in_specs=[
            pl.BlockSpec((TB, D_pad), lambda i: (i, 0)),  # x tiled over batch
            const(w1p), const(b1f),                       # weights VMEM-resident
            const(w2b), const(b2f),
            const(w3p), const(b3p),
        ],
        out_specs=pl.BlockSpec((TB, P), lambda i: (i, 0)),
        compiler_params=pltpu.CompilerParams(
            dimension_semantics=("parallel",)),           # v7x: 2 TCs share the grid
        cost_estimate=pl.CostEstimate(
            flops=flops, transcendentals=0, bytes_accessed=bytes_accessed),
    )(x, w1p, b1f, w2b, b2f, w3p, b3p)

    # torch.chunk(out, 2, dim=-1); clamp already fused in-kernel.
    mean = out[:, :num_actions]
    log_std = out[:, num_actions:A2]
    return mean, log_std


def init_params(key, num_inputs, num_actions, hidden_units=(256, 256)):
    """Deterministic Xavier-uniform init (matching initializer='xavier').

    Weights are stored as [in_features, out_features] so the kernel computes
    x @ W + b (transpose of PyTorch's nn.Linear weight layout).  Biases are
    zero-initialized; if porting weights from a torch checkpoint whose biases
    use nn.Linear's default uniform init, just load those values instead."""
    dims = [num_inputs, *hidden_units, num_actions * 2]
    params = []
    for i in range(len(dims) - 1):
        key, sub = jax.random.split(key)
        fan_in, fan_out = dims[i], dims[i + 1]
        limit = jnp.sqrt(6.0 / (fan_in + fan_out))
        w = jax.random.uniform(
            sub, (fan_in, fan_out), jnp.float32, -limit, limit
        )
        b = jnp.zeros((1, fan_out), jnp.float32)  # 2-D bias for TPU tiling
        params += [w, b]
    return tuple(params)


def _reference_bf16(states, params, num_actions):
    """Pure-JAX reference emulating the kernel's bf16 matmul operands."""
    w1, b1, w2, b2, w3, b3 = params
    bf = lambda a: a.astype(jnp.bfloat16)
    h1 = jnp.maximum(
        jnp.dot(bf(states), bf(w1), preferred_element_type=jnp.float32) + b1,
        0.0)
    h2 = jnp.maximum(
        jnp.dot(bf(h1), bf(w2), preferred_element_type=jnp.float32) + b2, 0.0)
    out = jnp.dot(bf(h2), bf(w3), preferred_element_type=jnp.float32) + b3
    mean, log_std = out[:, :num_actions], out[:, num_actions:]
    return mean, jnp.clip(log_std, LOG_STD_MIN, LOG_STD_MAX)


def _reference_f32(states, params, num_actions):
    """Full-precision reference matching the PyTorch module's arithmetic."""
    w1, b1, w2, b2, w3, b3 = params
    h1 = jnp.maximum(states @ w1 + b1, 0.0)
    h2 = jnp.maximum(h1 @ w2 + b2, 0.0)
    out = h2 @ w3 + b3
    mean, log_std = out[:, :num_actions], out[:, num_actions:]
    return mean, jnp.clip(log_std, LOG_STD_MIN, LOG_STD_MAX)


if __name__ == "__main__":
    num_inputs = 32
    num_actions = 8

    key = jax.random.PRNGKey(0)
    pkey, xkey = jax.random.split(key)
    params = init_params(pkey, num_inputs, num_actions)
    prepared = prepare_params(params)          # one-time; off the forward path

    # 8: single tiny tile; 300: single ragged tile; 2500: multi-step even grid.
    for batch in (8, 300, 2500):
        xkey, sub = jax.random.split(xkey)
        states = jax.random.normal(sub, (batch, num_inputs), jnp.float32)

        mean, log_std = gaussian_policy_forward(
            states, prepared, num_actions=num_actions
        )
        jax.block_until_ready((mean, log_std))

        assert mean.shape == (batch, num_actions)
        assert log_std.shape == (batch, num_actions)

        # Tight check vs. a bf16-operand-emulating reference (same arithmetic).
        ref_mean, ref_log_std = _reference_bf16(states, params, num_actions)
        assert jnp.allclose(mean, ref_mean, atol=2e-2, rtol=2e-2)
        assert jnp.allclose(log_std, ref_log_std, atol=2e-2, rtol=2e-2)

        # Loose check vs. the full-f32 (PyTorch-equivalent) reference to bound
        # the bf16 operand-rounding error against the true model semantics.
        f32_mean, f32_log_std = _reference_f32(states, params, num_actions)
        assert jnp.allclose(mean, f32_mean, atol=0.15, rtol=0.15)
        assert jnp.allclose(log_std, f32_log_std, atol=0.15, rtol=0.15)

        assert bool(jnp.all(log_std <= LOG_STD_MAX)) and bool(
            jnp.all(log_std >= LOG_STD_MIN)
        )

    print("KERNEL_OK")
</pallas_src>

<mosaic_0001>
module attributes {stable_mosaic.version = 11 : i64} {
  func.func @_policy_kernel(%arg0: i32, %arg1: memref<16x128xbf16, #tpu.memory_space<vmem>>, %arg2: memref<128x256xbf16, #tpu.memory_space<vmem>>, %arg3: memref<1x256xf32, #tpu.memory_space<vmem>>, %arg4: memref<256x256xbf16, #tpu.memory_space<vmem>>, %arg5: memref<1x256xf32, #tpu.memory_space<vmem>>, %arg6: memref<256x128xbf16, #tpu.memory_space<vmem>>, %arg7: memref<1x128xf32, #tpu.memory_space<vmem>>, %arg8: memref<16x128xf32, #tpu.memory_space<vmem>>) attributes {dimension_semantics = [#tpu.dimension_semantics<parallel>], iteration_bounds = array<i64: 1>, scalar_prefetch = 0 : i64, scratch_operands = 0 : i64, tpu.core_type = #tpu.core_type<tc>, window_params = [{transform_indices = @transform_0, window_bounds = array<i64: 16, 128>}, {pipeline_mode = #tpu.pipeline_mode<synchronous>, transform_indices = @transform_1, window_bounds = array<i64: 128, 256>}, {pipeline_mode = #tpu.pipeline_mode<synchronous>, transform_indices = @transform_2, window_bounds = array<i64: 1, 256>}, {pipeline_mode = #tpu.pipeline_mode<synchronous>, transform_indices = @transform_3, window_bounds = array<i64: 256, 256>}, {pipeline_mode = #tpu.pipeline_mode<synchronous>, transform_indices = @transform_4, window_bounds = array<i64: 1, 256>}, {pipeline_mode = #tpu.pipeline_mode<synchronous>, transform_indices = @transform_5, window_bounds = array<i64: 256, 128>}, {pipeline_mode = #tpu.pipeline_mode<synchronous>, transform_indices = @transform_6, window_bounds = array<i64: 1, 128>}, {transform_indices = @transform_7, window_bounds = array<i64: 16, 128>}]} {
    %c0 = arith.constant 0 : index
    %c0_0 = arith.constant 0 : index
    %0 = vector.load %arg1[%c0, %c0_0] : memref<16x128xbf16, #tpu.memory_space<vmem>>, vector<16x128xbf16>
    %c0_1 = arith.constant 0 : index
    %c0_2 = arith.constant 0 : index
    %1 = vector.load %arg2[%c0_1, %c0_2] : memref<128x256xbf16, #tpu.memory_space<vmem>>, vector<128x256xbf16>
    %cst = arith.constant dense<0.000000e+00> : vector<16x256xf32>
    %2 = tpu.matmul %0, %1, %cst {dimension_numbers = #tpu.dot_dimension_numbers<[1], [0], [0], [1], [0, 0, 1, 1], [], []>} : vector<16x128xbf16>, vector<128x256xbf16>, vector<16x256xf32> -> vector<16x256xf32>
    %c0_3 = arith.constant 0 : index
    %c0_4 = arith.constant 0 : index
    %3 = vector.load %arg3[%c0_3, %c0_4] : memref<1x256xf32, #tpu.memory_space<vmem>>, vector<1x256xf32>
    %4 = vector.broadcast %3 : vector<1x256xf32> to vector<16x256xf32>
    %5 = arith.addf %2, %4 : vector<16x256xf32>
    %cst_5 = arith.constant 0.000000e+00 : f32
    %6 = vector.broadcast %cst_5 : f32 to vector<16x256xf32>
    %7 = arith.maximumf %5, %6 : vector<16x256xf32>
    %8 = arith.truncf %7 : vector<16x256xf32> to vector<16x256xbf16>
    %c0_6 = arith.constant 0 : index
    %c0_7 = arith.constant 0 : index
    %9 = vector.load %arg4[%c0_6, %c0_7] : memref<256x256xbf16, #tpu.memory_space<vmem>>, vector<256x256xbf16>
    %cst_8 = arith.constant dense<0.000000e+00> : vector<16x256xf32>
    %10 = tpu.matmul %8, %9, %cst_8 {dimension_numbers = #tpu.dot_dimension_numbers<[1], [0], [0], [1], [0, 0, 1, 1], [], []>} : vector<16x256xbf16>, vector<256x256xbf16>, vector<16x256xf32> -> vector<16x256xf32>
    %c0_9 = arith.constant 0 : index
    %c0_10 = arith.constant 0 : index
    %11 = vector.load %arg5[%c0_9, %c0_10] : memref<1x256xf32, #tpu.memory_space<vmem>>, vector<1x256xf32>
    %12 = vector.broadcast %11 : vector<1x256xf32> to vector<16x256xf32>
    %13 = arith.addf %10, %12 : vector<16x256xf32>
    %cst_11 = arith.constant 0.000000e+00 : f32
    %14 = vector.broadcast %cst_11 : f32 to vector<16x256xf32>
    %15 = arith.maximumf %13, %14 : vector<16x256xf32>
    %16 = arith.truncf %15 : vector<16x256xf32> to vector<16x256xbf16>
    %c0_12 = arith.constant 0 : index
    %c0_13 = arith.constant 0 : index
    %17 = vector.load %arg6[%c0_12, %c0_13] : memref<256x128xbf16, #tpu.memory_space<vmem>>, vector<256x128xbf16>
    %cst_14 = arith.constant dense<0.000000e+00> : vector<16x128xf32>
    %18 = tpu.matmul %16, %17, %cst_14 {dimension_numbers = #tpu.dot_dimension_numbers<[1], [0], [0], [1], [0, 0, 1, 1], [], []>} : vector<16x256xbf16>, vector<256x128xbf16>, vector<16x128xf32> -> vector<16x128xf32>
    %c0_15 = arith.constant 0 : index
    %c0_16 = arith.constant 0 : index
    %19 = vector.load %arg7[%c0_15, %c0_16] : memref<1x128xf32, #tpu.memory_space<vmem>>, vector<1x128xf32>
    %20 = vector.broadcast %19 : vector<1x128xf32> to vector<16x128xf32>
    %21 = arith.addf %18, %20 : vector<16x128xf32>
    %22 = tpu.iota {dimensions = array<i32: 1>} : vector<16x128xi32>
    %c8_i32 = arith.constant 8 : i32
    %23 = vector.broadcast %c8_i32 : i32 to vector<16x128xi32>
    %24 = arith.cmpi sge, %22, %23 : vector<16x128xi32>
    %cst_17 = arith.constant -2.000000e+01 : f32
    %cst_18 = arith.constant 2.000000e+00 : f32
    %25 = vector.broadcast %cst_17 : f32 to vector<16x128xf32>
    %26 = arith.maximumf %25, %21 : vector<16x128xf32>
    %27 = vector.broadcast %cst_18 : f32 to vector<16x128xf32>
    %28 = arith.minimumf %27, %26 : vector<16x128xf32>
    %29 = arith.select %24, %28, %21 : vector<16x128xi1>, vector<16x128xf32>
    %c0_19 = arith.constant 0 : index
    %c0_20 = arith.constant 0 : index
    %30 = vector.load %arg8[%c0_19, %c0_20] : memref<16x128xf32, #tpu.memory_space<vmem>>, vector<16x128xf32>
    tpu.vector_store %arg8[%c0_19, %c0_20], %29 {strides = array<i32>} : memref<16x128xf32, #tpu.memory_space<vmem>>, vector<16x128xf32>,
    return
  }
  func.func @transform_0(%arg0: i32) -> (i32, i32) {
    %c0_i32 = arith.constant 0 : i32
    %c0_i32_0 = arith.constant 0 : i32
    return %arg0, %c0_i32 : i32, i32
  }
  func.func @transform_1(%arg0: i32) -> (i32, i32) {
    %c0_i32 = arith.constant 0 : i32
    %c0_i32_0 = arith.constant 0 : i32
    %c0_i32_1 = arith.constant 0 : i32
    return %c0_i32, %c0_i32_0 : i32, i32
  }
  func.func @transform_2(%arg0: i32) -> (i32, i32) {
    %c0_i32 = arith.constant 0 : i32
    %c0_i32_0 = arith.constant 0 : i32
    %c0_i32_1 = arith.constant 0 : i32
    return %c0_i32, %c0_i32_0 : i32, i32
  }
  func.func @transform_3(%arg0: i32) -> (i32, i32) {
    %c0_i32 = arith.constant 0 : i32
    %c0_i32_0 = arith.constant 0 : i32
    %c0_i32_1 = arith.constant 0 : i32
    return %c0_i32, %c0_i32_0 : i32, i32
  }
  func.func @transform_4(%arg0: i32) -> (i32, i32) {
    %c0_i32 = arith.constant 0 : i32
    %c0_i32_0 = arith.constant 0 : i32
    %c0_i32_1 = arith.constant 0 : i32
    return %c0_i32, %c0_i32_0 : i32, i32
  }
  func.func @transform_5(%arg0: i32) -> (i32, i32) {
    %c0_i32 = arith.constant 0 : i32
    %c0_i32_0 = arith.constant 0 : i32
    %c0_i32_1 = arith.constant 0 : i32
    return %c0_i32, %c0_i32_0 : i32, i32
  }
  func.func @transform_6(%arg0: i32) -> (i32, i32) {
    %c0_i32 = arith.constant 0 : i32
    %c0_i32_0 = arith.constant 0 : i32
    %c0_i32_1 = arith.constant 0 : i32
    return %c0_i32, %c0_i32_0 : i32, i32
  }
  func.func @transform_7(%arg0: i32) -> (i32, i32) {
    %c0_i32 = arith.constant 0 : i32
    %c0_i32_0 = arith.constant 0 : i32
    return %arg0, %c0_i32 : i32, i32
  }
}

</mosaic_0001>

<bundles_post_ra>
// kernel: gaussian_policy_forward.1
= control target key start
LH: loop header
LB: loop body
LE: loop exit
PB: predicated region body
PF: predicated region fallthrough
CT: control target
= control target key end

     0   :  { %12 = vsyncpa [#allocation3], 0  ;;  %s1037_s0 = inlined_call_operand.vmem [shape: bf16[8,128], index: 0, kind: input, shape index: {}]   ;;  %s1038_s1 = inlined_call_operand.hbm [shape: bf16[128,256], index: 1, kind: input, shape index: {}]   ;;  %s1039_s2 = inlined_call_operand.vmem [shape: f32[1,256], index: 2, kind: input, shape index: {}]   ;;  %s1040_s3 = inlined_call_operand.hbm [shape: bf16[256,256], index: 3, kind: input, shape index: {}]   ;;  %s1041_s4 = inlined_call_operand.vmem [shape: f32[1,256], index: 4, kind: input, shape index: {}]   ;;  %s1042_s5 = inlined_call_operand.hbm [shape: bf16[256,128], index: 5, kind: input, shape index: {}]   ;;  %s1043_s6 = inlined_call_operand.vmem [shape: f32[1,128], index: 6, kind: input, shape index: {}]   ;;  %s1044_s7 = inlined_call_operand.vmem [shape: f32[8,128], index: 7, kind: output, shape index: {}]  }
   0x1   :  { %13 = vsyncpa [#allocation5], 0  ;;  %s965_s24 = smov [#allocation4]   ;;  %s966_s26 = smov [#allocation2]  }
   0x2   :  { %s35_s25 = sshll.u32 %s965_s24, 4  ;;  %s21_s27 = sshll.u32 %s966_s26, 4  ;;  %s36_s25 = int_to_ptr.vmem [resolvable:$true] %s35_s25  ;;  %s22_s27 = int_to_ptr.vmem [resolvable:$true] %s21_s27 }
   0x3   :  { %s909_s28 = scalar_lea.vmem %s36_s25, 4096  ;;  %p914_p1 = scmp.lt.s32.totalorder %s36_s25, %s36_s25 }
   0x4   :  { %p910_p0 = scmp.ne.s32.totalorder %s36_s25, %s909_s28  ;;  %p915_p2 = scmp.lt.s32.totalorder %s909_s28, %s909_s28 }
   0x6   :  { %p916_p3 = por %p915_p2, %p914_p1 }
   0x8   :  { %p917_p4 = pnand %p916_p3, %p910_p0 }
   0xa   :  { %920 = shalt.err (!%p917_p4)
}
   0xb   :  { %s967_s29 = smov 128   ;;  %s968_s30 = smov 8  }
   0xc   :  { %41 = dma.hbm_to_vmem [thread:$0]  %s1040_s3, 4096, %s36_s25, [#allocation5], %s967_s29, %s967_s29, %s968_s30  }
   0xd   :  { %s929_s10 = scalar_lea.vmem %s22_s27, 2048  ;;  %p934_p6 = scmp.lt.s32.totalorder %s22_s27, %s22_s27 }
   0xe   :  { %p930_p5 = scmp.ne.s32.totalorder %s22_s27, %s929_s10  ;;  %p935_p7 = scmp.lt.s32.totalorder %s929_s10, %s929_s10 }
  0x10   :  { %p936_p8 = por %p935_p7, %p934_p6 }
  0x12   :  { %p937_p9 = pnand %p936_p8, %p930_p5 }
  0x14   :  { %940 = shalt.err (!%p937_p9)
}
  0x15   :  { %27 = dma.hbm_to_vmem [thread:$0]  %s1038_s1, 2048, %s22_s27, [#allocation3], %s967_s29, %s967_s29, %s968_s30  }
  0x16   :  { %s969_s13 = smov [#allocation6]  }
  0x17   :  { %s49_s14 = sshll.u32 %s969_s13, 4  ;;  %s50_s14 = int_to_ptr.vmem [resolvable:$true] %s49_s14 }
  0x18   :  { %s949_s15 = scalar_lea.vmem %s50_s14, 2048  ;;  %p954_p11 = scmp.lt.s32.totalorder %s50_s14, %s50_s14 }
  0x19   :  { %p950_p10 = scmp.ne.s32.totalorder %s50_s14, %s949_s15  ;;  %p955_p12 = scmp.lt.s32.totalorder %s949_s15, %s949_s15 }
  0x1b   :  { %p956_p13 = por %p955_p12, %p954_p11 }
  0x1d   :  { %p957_p0 = pnand %p956_p13, %p950_p10 }
  0x1f   :  { %960 = shalt.err (!%p957_p0)
}
  0x20   :  { %s970_s3 = smov 64   ;;  %s971_s16 = smov 4  }
  0x21   :  { %55 = dma.hbm_to_vmem [thread:$0]  %s1042_s5, 2048, %s50_s14, [#allocation5], %s970_s3, %s970_s3, %s971_s16  }
  0x22   :  { %961 = dma.done.wait [#allocation3], 2048  }
  0x23   :  { %962 = vsyncadd [#allocation3], 4294965248 }
  0x24   :  { %963 = dma.done.wait [#allocation5], 6144  }
  0x25   :  { %964 = vsyncadd [#allocation5], 4294961152  ;;  %v972_v0 = vmov 0   ;;  %v812_v1 = vld [vmem:[#allocation2 + $0x74] ss:$8 sps:$4 sm:$0xff]   ;;  %v836_v27 = vld [vmem:[%s1037_s0] sm:$0xff]   ;;  %v88_v60 = vlaneseq }
  0x26   :  { %216 = vmatprep.mubr.bf16.mxu0 %v972_v0  ;;  %v814_v2 = vld [vmem:[#allocation2 + $0x70] ss:$8 sps:$4 sm:$0xff]   ;;  %184 = vmatprep.subr.bf16.mxu0 %v812_v1  ;;  %v815_v3 = vld [vmem:[#allocation2 + $0x64] ss:$8 sps:$4 sm:$0xff]   ;;  %v817_v4 = vld [vmem:[#allocation2 + $0x60] ss:$8 sps:$4 sm:$0xff]  }
  0x27   :  { %185 = vmatpush1.bf16.msra.mxu0 %v814_v2  ;;  %v818_v5 = vld [vmem:[#allocation2 + $0x54] ss:$8 sps:$4 sm:$0xff]   ;;  %v820_v6 = vld [vmem:[#allocation2 + $0x50] ss:$8 sps:$4 sm:$0xff]   ;;  %v821_v7 = vld [vmem:[#allocation2 + $0x44] ss:$8 sps:$4 sm:$0xff]  }
  0x28   :  { %186 = vmatprep.subr.bf16.mxu0 %v815_v3  ;;  %v823_v8 = vld [vmem:[#allocation2 + $0x40] ss:$8 sps:$4 sm:$0xff]   ;;  %v824_v9 = vld [vmem:[#allocation2 + $0x34] ss:$8 sps:$4 sm:$0xff]   ;;  %v839_v11 = vld [vmem:[#allocation4 + $0x70] ss:$8 sps:$4 sm:$0xff]  }
  0x29   :  { %v837_v10 = vld [vmem:[#allocation4 + $0x74] ss:$8 sps:$4 sm:$0xff]   ;;  %v840_v12 = vld [vmem:[#allocation4 + $0x64] ss:$8 sps:$4 sm:$0xff]   ;;  %v826_v13 = vld [vmem:[#allocation2 + $0x30] ss:$8 sps:$4 sm:$0xff]  }
  0x2a   :  { %437 = vmatprep.subr.bf16.mxu1 %v837_v10  ;;  %v842_v14 = vld [vmem:[#allocation4 + $0x60] ss:$8 sps:$4 sm:$0xff]   ;;  %v827_v15 = vld [vmem:[#allocation2 + $0x24] ss:$8 sps:$4 sm:$0xff]   ;;  %v843_v16 = vld [vmem:[#allocation4 + $0x54] ss:$8 sps:$4 sm:$0xff]  }
  0x2b   :  { %187 = vmatpush1.bf16.msra.mxu0 %v817_v4  ;;  %438 = vmatpush1.bf16.msra.mxu1 %v839_v11  ;;  %v829_v17 = vld [vmem:[#allocation2 + $0x20] ss:$8 sps:$4 sm:$0xff]   ;;  %v845_v18 = vld [vmem:[#allocation4 + $0x50] ss:$8 sps:$4 sm:$0xff]   ;;  %v830_v19 = vld [vmem:[#allocation2 + $0x14] ss:$8 sps:$4 sm:$0xff]  }
  0x2c   :  { %188 = vmatprep.subr.bf16.mxu0 %v818_v5  ;;  %439 = vmatprep.subr.bf16.mxu1 %v840_v12  ;;  %v846_v20 = vld [vmem:[#allocation4 + $0x44] ss:$8 sps:$4 sm:$0xff]   ;;  %v832_v21 = vld [vmem:[#allocation2 + $0x10] ss:$8 sps:$4 sm:$0xff]   ;;  %v848_v22 = vld [vmem:[#allocation4 + $0x40] ss:$8 sps:$4 sm:$0xff]  }
  0x2d   :  { %v833_v23 = vld [vmem:[#allocation2 + $0x4] ss:$8 sps:$4 sm:$0xff]   ;;  %v849_v24 = vld [vmem:[#allocation4 + $0x34] ss:$8 sps:$4 sm:$0xff]   ;;  %v835_v25 = vld [vmem:[#allocation2] ss:$8 sps:$4 sm:$0xff]  }
  0x2e   :  { %v851_v26 = vld [vmem:[#allocation4 + $0x30] ss:$8 sps:$4 sm:$0xff]   ;;  %v852_v28 = vld [vmem:[#allocation4 + $0x24] ss:$8 sps:$4 sm:$0xff]   ;;  %v854_v29 = vld [vmem:[#allocation4 + $0x20] ss:$8 sps:$4 sm:$0xff]  }
  0x2f   :  { %189 = vmatpush1.bf16.msra.mxu0 %v820_v6  ;;  %440 = vmatpush1.bf16.msra.mxu1 %v842_v14  ;;  %v855_v30 = vld [vmem:[#allocation4 + $0x14] ss:$8 sps:$4 sm:$0xff]   ;;  %v857_v31 = vld [vmem:[#allocation4 + $0x10] ss:$8 sps:$4 sm:$0xff]   ;;  %v858_v32 = vld [vmem:[#allocation4 + $0x4] ss:$8 sps:$4 sm:$0xff]  }
  0x30   :  { %190 = vmatprep.subr.bf16.mxu0 %v821_v7  ;;  %441 = vmatprep.subr.bf16.mxu1 %v843_v16  ;;  %v860_v33 = vld [vmem:[#allocation4] ss:$8 sps:$4 sm:$0xff]   ;;  %v861_v34 = vld [vmem:[#allocation4 + $0xf4] ss:$8 sps:$4 sm:$0xff]   ;;  %v863_v35 = vld [vmem:[#allocation4 + $0xf0] ss:$8 sps:$4 sm:$0xff]  }
  0x31   :  { %v864_v36 = vld [vmem:[#allocation4 + $0xe4] ss:$8 sps:$4 sm:$0xff]   ;;  %v866_v37 = vld [vmem:[#allocation4 + $0xe0] ss:$8 sps:$4 sm:$0xff]   ;;  %v867_v38 = vld [vmem:[#allocation4 + $0xd4] ss:$8 sps:$4 sm:$0xff]  }
  0x32   :  { %v869_v39 = vld [vmem:[#allocation4 + $0xd0] ss:$8 sps:$4 sm:$0xff]   ;;  %v870_v40 = vld [vmem:[#allocation4 + $0xc4] ss:$8 sps:$4 sm:$0xff]   ;;  %v872_v41 = vld [vmem:[#allocation4 + $0xc0] ss:$8 sps:$4 sm:$0xff]  }
  0x33   :  { %191 = vmatpush1.bf16.msra.mxu0 %v823_v8  ;;  %442 = vmatpush1.bf16.msra.mxu1 %v845_v18  ;;  %v873_v42 = vld [vmem:[#allocation4 + $0xb4] ss:$8 sps:$4 sm:$0xff]   ;;  %v875_v43 = vld [vmem:[#allocation4 + $0xb0] ss:$8 sps:$4 sm:$0xff]   ;;  %v876_v44 = vld [vmem:[#allocation4 + $0xa4] ss:$8 sps:$4 sm:$0xff]  }
  0x34   :  { %192 = vmatprep.subr.bf16.mxu0 %v824_v9  ;;  %443 = vmatprep.subr.bf16.mxu1 %v846_v20  ;;  %v878_v45 = vld [vmem:[#allocation4 + $0xa0] ss:$8 sps:$4 sm:$0xff]   ;;  %v879_v46 = vld [vmem:[#allocation4 + $0x94] ss:$8 sps:$4 sm:$0xff]   ;;  %v881_v47 = vld [vmem:[#allocation4 + $0x90] ss:$8 sps:$4 sm:$0xff]  }
  0x35   :  { %v882_v48 = vld [vmem:[#allocation4 + $0x84] ss:$8 sps:$4 sm:$0xff]   ;;  %v884_v49 = vld [vmem:[#allocation4 + $0x80] ss:$8 sps:$4 sm:$0xff]   ;;  %v885_v50 = vld [vmem:[#allocation6 + $0x78] sm:$0xff]   ;;  %v89_v61 = vshrl.u32 %v88_v60, 7 }
  0x36   :  { %v886_v51 = vld [vmem:[#allocation6 + $0x38] sm:$0xff]   ;;  %v887_v52 = vld [vmem:[#allocation6 + $0x70] sm:$0xff]   ;;  %v889_v54 = vld [vmem:[#allocation6 + $0x68] sm:$0xff]  }
  0x37   :  { %193 = vmatpush1.bf16.msra.mxu0 %v826_v13  ;;  %444 = vmatpush1.bf16.msra.mxu1 %v848_v22  ;;  %v888_v53 = vld [vmem:[#allocation6 + $0x30] sm:$0xff]   ;;  %v890_v55 = vld [vmem:[#allocation6 + $0x28] sm:$0xff]   ;;  %v891_v56 = vld [vmem:[#allocation6 + $0x60] sm:$0xff]   ;;  %v94_v62 = vsub.s32 1, %v89_v61  ;;  %v90_v63 = vsub.s32 0, %v89_v61 }
  0x38   :  { %194 = vmatprep.subr.bf16.mxu0 %v827_v15  ;;  %445 = vmatprep.subr.bf16.mxu1 %v849_v24  ;;  %v892_v57 = vld [vmem:[#allocation6 + $0x20] sm:$0xff]   ;;  %v893_v58 = vld [vmem:[#allocation6 + $0x58] sm:$0xff]   ;;  %v896_v18 = vld [vmem:[#allocation6 + $0x10] sm:$0xff]  }
  0x39   :  { %v894_v59 = vld [vmem:[#allocation6 + $0x18] sm:$0xff]   ;;  %v86_v0 = vld [vmem:[%s1039_s2] sm:$0x3]  ;;  %v898_v20 = vld [vmem:[#allocation6 + $0x8] sm:$0xff]  }
  0x3a   :  { %v95_v2 = vrot.slane %v86_v0, %v94_v62  ;;  %v91_v3 = vrot.slane %v86_v0, %v90_v63  ;;  %v900_v22 = vld [vmem:[#allocation6] sm:$0xff]  }
  0x3b   :  { %195 = vmatpush1.bf16.msra.mxu0 %v829_v17  ;;  %446 = vmatpush1.bf16.msra.mxu1 %v851_v26  ;;  %v895_v17 = vld [vmem:[#allocation6 + $0x50] sm:$0xff]  }
  0x3c   :  { %196 = vmatprep.subr.bf16.mxu0 %v830_v19  ;;  %447 = vmatprep.subr.bf16.mxu1 %v852_v28  ;;  %v897_v19 = vld [vmem:[#allocation6 + $0x48] sm:$0xff]  }
  0x3f   :  { %197 = vmatpush1.bf16.msra.mxu0 %v832_v21  ;;  %448 = vmatpush1.bf16.msra.mxu1 %v854_v29  ;;  %v899_v21 = vld [vmem:[#allocation6 + $0x40] sm:$0xff]  }
  0x40   :  { %198 = vmatprep.subr.bf16.mxu0 %v833_v23  ;;  %449 = vmatprep.subr.bf16.mxu1 %v855_v30  ;;  %v265_v23 = vld [vmem:[%s1041_s4] sm:$0x3] }
  0x41   :  { %v270_v26 = vrot.slane %v265_v23, %v90_v63 }
  0x43   :  { %199 = vmatpush1.bf16.msra.mxu0 %v835_v25  ;;  %450 = vmatpush1.bf16.msra.mxu1 %v857_v31  ;;  %v274_v25 = vrot.slane %v265_v23, %v94_v62 }
  0x44   :  { %451 = vmatprep.subr.bf16.mxu1 %v858_v32  ;;  %782 = vmatprep.subr.bf16.mxu0 %v885_v50 }
  0x46   :  { %217 = vmatmul.mubr.bf16.vlgmr.msra.gmra.mxu0 %v836_v27 }
  0x47   :  { %452 = vmatpush1.bf16.msra.mxu1 %v860_v33  ;;  %783 = vmatpush3.bf16.msra.mxu0 %v886_v51 }
  0x48   :  { %453 = vmatprep.subr.bf16.mxu1 %v861_v34  ;;  %784 = vmatprep.subr.bf16.mxu0 %v887_v52 }
  0x4b   :  { %454 = vmatpush2.bf16.msra.mxu1 %v863_v35  ;;  %785 = vmatpush3.bf16.msra.mxu0 %v888_v53 }
  0x4c   :  { %455 = vmatprep.subr.bf16.mxu1 %v864_v36  ;;  %786 = vmatprep.subr.bf16.mxu0 %v889_v54 }
  0x4f   :  { %456 = vmatpush2.bf16.msra.mxu1 %v866_v37  ;;  %787 = vmatpush3.bf16.msra.mxu0 %v890_v55 }
  0x50   :  { %457 = vmatprep.subr.bf16.mxu1 %v867_v38  ;;  %788 = vmatprep.subr.bf16.mxu0 %v891_v56 }
  0x53   :  { %458 = vmatpush2.bf16.msra.mxu1 %v869_v39  ;;  %789 = vmatpush3.bf16.msra.mxu0 %v892_v57 }
  0x54   :  { %459 = vmatprep.subr.bf16.mxu1 %v870_v40  ;;  %790 = vmatprep.subr.bf16.mxu0 %v893_v58 }
  0x57   :  { %460 = vmatpush2.bf16.msra.mxu1 %v872_v41  ;;  %791 = vmatpush3.bf16.msra.mxu0 %v894_v59  ;;  %v765_v41 = vld [vmem:[%s1043_s6] ss:$0 sm:$0xff] }
  0x58   :  { %461 = vmatprep.subr.bf16.mxu1 %v873_v42  ;;  %792 = vmatprep.subr.bf16.mxu0 %v895_v17 }
  0x5b   :  { %462 = vmatpush2.bf16.msra.mxu1 %v875_v43  ;;  %793 = vmatpush3.bf16.msra.mxu0 %v896_v18 }
  0x5c   :  { %463 = vmatprep.subr.bf16.mxu1 %v876_v44  ;;  %794 = vmatprep.subr.bf16.mxu0 %v897_v19  ;;  %v663_v44 = vand.u32 127, %v88_v60 }
  0x5e   :  { %vm664_vm0 = vcmp.ge.s32.totalorder %v663_v44, 8 }
  0x5f   :  { %464 = vmatpush2.bf16.msra.mxu1 %v878_v45  ;;  %795 = vmatpush3.bf16.msra.mxu0 %v898_v20 }
  0x60   :  { %465 = vmatprep.subr.bf16.mxu1 %v879_v46  ;;  %796 = vmatprep.subr.bf16.mxu0 %v899_v21 }
  0x63   :  { %466 = vmatpush2.bf16.msra.mxu1 %v881_v47  ;;  %797 = vmatpush3.bf16.msra.mxu0 %v900_v22 }
  0x64   :  { %467 = vmatprep.subr.bf16.mxu1 %v882_v48 }
  0x67   :  { %468 = vmatpush2.bf16.msra.mxu1 %v884_v49 }
 0x106   :  { %v218_v1 = vpop.f32.mrf.mxu0 }
 0x107   :  { %v219_v8 = vadd.f32 %v218_v1, %v91_v3 }
 0x108   :  { %v220_v4 = vpop.f32.mrf.mxu0 }
 0x109   :  { %v221_v6 = vadd.f32 %v220_v4, %v95_v2  ;;  %v227_v14 = vmax.f32 %v219_v8, 0.0 }
 0x10a   :  { %v222_v5 = vpop.f32.mrf.mxu0 }
 0x10b   :  { %v223_v7 = vadd.f32 %v222_v5, %v91_v3  ;;  %v228_v12 = vmax.f32 %v221_v6, 0.0 }
 0x10c   :  { %v224_v9 = vpop.f32.mrf.mxu0 }
 0x10d   :  { %v225_v10 = vadd.f32 %v224_v9, %v95_v2  ;;  %v229_v11 = vmax.f32 %v223_v7, 0.0 }
 0x10f   :  { %v230_v13 = vmax.f32 %v225_v10, 0.0  ;;  %v231_v16 = vpack.c.bf16 %v229_v11, %v227_v14 }
 0x111   :  { %v232_v15 = vpack.c.bf16 %v230_v13, %v228_v12 }
 0x113   :  { %469 = vmatprep.mubr.bf16.mxu1 %v232_v15 }
 0x114   :  { %470 = vmatmul.mubr.bf16.vlgmr.msra.gmra.mxu1 %v231_v16 }
 0x1d4   :  { %v471_v24 = vpop.f32.mrf.mxu1 }
 0x1d5   :  { %v472_v31 = vadd.f32 %v471_v24, %v270_v26 }
 0x1d6   :  { %v473_v27 = vpop.f32.mrf.mxu1 }
 0x1d7   :  { %v474_v29 = vadd.f32 %v473_v27, %v274_v25  ;;  %v480_v37 = vmax.f32 %v472_v31, 0.0 }
 0x1d8   :  { %v475_v28 = vpop.f32.mrf.mxu1 }
 0x1d9   :  { %v476_v30 = vadd.f32 %v475_v28, %v270_v26  ;;  %v481_v35 = vmax.f32 %v474_v29, 0.0 }
 0x1da   :  { %v477_v32 = vpop.f32.mrf.mxu1 }
 0x1db   :  { %v478_v33 = vadd.f32 %v477_v32, %v274_v25  ;;  %v482_v34 = vmax.f32 %v476_v30, 0.0 }
 0x1dd   :  { %v483_v36 = vmax.f32 %v478_v33, 0.0  ;;  %v484_v39 = vpack.c.bf16 %v482_v34, %v480_v37 }
 0x1df   :  { %v485_v38 = vpack.c.bf16 %v483_v36, %v481_v35 }
 0x1e1   :  { %653 = vmatprep.mubr.bf16.mxu0 %v485_v38 }
 0x1e2   :  { %654 = vmatmul.mubr.bf16.vlgmr.msra.gmra.mxu0 %v484_v39 }
 0x2a2   :  { %v798_v40 = vpop.f32.mrf.mxu0 }
 0x2a4   :  { %v799_v42 = vpop.f32.mrf.mxu0 }
 0x2a5   :  { %v800_v43 = vadd.f32 %v799_v42, %v798_v40 }
 0x2a6   :  { %v801_v45 = vpop.f32.mrf.mxu0 }
 0x2a7   :  { %v656_v46 = vadd.f32 %v800_v43, %v765_v41 }
 0x2a8   :  { %v802_v47 = vpop.f32.mrf.mxu0 }
 0x2a9   :  { %v665_v48 = vmax.f32 %v656_v46, -20.0 }
 0x2ab   :  { %v667_v49 = vmin.f32 %v665_v48, 2.0 }
 0x2ad   :  { %v669_v50 = vsel %vm664_vm0, %v667_v49, %v656_v46 }
 0x2ae   :  { %704 = vst [vmem:[%s1044_s7] sm:$0xff] %v669_v50 }
 0x2af   :  { %710 = vsyncpa [#allocation3], 1 }
 0x2b0   :  { %711 = vsyncpa [#allocation5], 1 }

</bundles_post_ra>
